<compile_context>
chip_gen: v7x
topology: tpu7x:2x2x1
jax: 0.10.0
libtpu: 0.0.40
codegen_flags: <defaults>
</compile_context>

<pallas_src>
import jax
import jax.numpy as jnp
from jax import lax
from jax.experimental import pallas as pl
from jax.experimental.pallas import tpu as pltpu


def _cascade_gcn_kernel(x_ref, w_ref, o_ref):
    """x_ref: (1, N, C); w_ref: (loop, C, C); o_ref: (1, N, C)."""
    n_layers = w_ref.shape[0]
    state0 = x_ref[0].astype(jnp.float32)          # (N, C)

    def layer(l, state):
        w = w_ref[l]                               # (C, C) this layer's weight

        # adj = state @ state^T  -> (N, N)   (contract over channels, last dim)
        adj = lax.dot_general(
            state, state, (((1,), (1,)), ((), ())),
            preferred_element_type=jnp.float32)

        # Numerically stable row softmax over the last axis.
        adj_max = jnp.max(adj, axis=-1, keepdims=True)
        adj_exp = jnp.exp(adj - adj_max)
        denom = jnp.sum(adj_exp, axis=-1, keepdims=True)
        # EUP approximate reciprocal + one Newton step (2 VPU ops on (N,1)).
        inv = pl.reciprocal(denom, approx=True)
        inv = inv * (2.0 - denom * inv)
        adj_sm = adj_exp * inv

        # support = state @ W -> (N, C)
        support = jnp.dot(state, w, preferred_element_type=jnp.float32)

        # new state = softmax(adj) @ support -> (N, C)
        return jnp.dot(adj_sm, support, preferred_element_type=jnp.float32)

    state = lax.fori_loop(0, n_layers, layer, state0, unroll=True)

    # Final ReLU and single writeback for this batch element.
    o_ref[0] = jnp.maximum(state, 0.0).astype(o_ref.dtype)


def cascade_gcnet(x, weights):
    """x: (B, C, N) float32.  weights: (loop, C, C) float32.  Returns (B, C, N)."""
    B, C, N = x.shape
    loop = weights.shape[0]

    # Kernel-internal layout is (N, C): all contractions become last-dim forms.
    x_nc = jnp.transpose(x, (0, 2, 1))             # (B, N, C)

    itemsize = jnp.dtype(x.dtype).itemsize
    flops = B * loop * (2 * N * N * C + 2 * N * C * C + 2 * N * N * C)
    cost = pl.CostEstimate(
        flops=flops,
        transcendentals=B * loop * N * N,          # exp in the softmax
        bytes_accessed=(2 * B * N * C + loop * C * C) * itemsize,
    )

    out_nc = pl.pallas_call(
        _cascade_gcn_kernel,
        out_shape=jax.ShapeDtypeStruct((B, N, C), x.dtype),
        grid_spec=pltpu.PrefetchScalarGridSpec(
            num_scalar_prefetch=0,
            grid=(B,),
            in_specs=[
                pl.BlockSpec((1, N, C), lambda b: (b, 0, 0)),
                pl.BlockSpec((loop, C, C), lambda b: (0, 0, 0)),
            ],
            out_specs=pl.BlockSpec((1, N, C), lambda b: (b, 0, 0)),
        ),
        compiler_params=pltpu.CompilerParams(
            dimension_semantics=("parallel",)),
        cost_estimate=cost,
    )(x_nc, weights)

    return jnp.transpose(out_nc, (0, 2, 1))        # back to (B, C, N)


def cascade_gcnet_ref(x, weights):
    """Pure-JAX reference mirroring the PyTorch forward."""
    for l in range(weights.shape[0]):
        w = weights[l]
        x_t = jnp.transpose(x, (0, 2, 1))                      # (B, N, C)
        adj = jnp.matmul(x_t, x)                               # (B, N, N)
        adj = jax.nn.softmax(adj, axis=2)
        support = jnp.matmul(x_t, w)                           # (B, N, C)
        x = jnp.transpose(jnp.matmul(adj, support), (0, 2, 1))  # (B, C, N)
    return jax.nn.relu(x)


if __name__ == "__main__":
    B, dim, N, loop = 2, 8, 16, 3

    key = jax.random.PRNGKey(0)
    kx, *kws = jax.random.split(key, 1 + loop)

    x = jax.random.normal(kx, (B, dim, N), dtype=jnp.float32)

    # GraphConvNet weight init: uniform(-stdv, stdv), stdv = 1/sqrt(out_features)
    stdv = 1.0 / (dim ** 0.5)
    weights = jnp.stack([
        jax.random.uniform(k, (dim, dim), dtype=jnp.float32,
                           minval=-stdv, maxval=stdv)
        for k in kws
    ])

    out = cascade_gcnet(x, weights)
    out = jax.block_until_ready(out)

    ref = cascade_gcnet_ref(x, weights)
    assert out.shape == (B, dim, N)
    assert jnp.allclose(out, ref, atol=1e-4, rtol=1e-4), "mismatch vs reference"

    print("KERNEL_OK")
</pallas_src>

<mosaic_0001>
module attributes {stable_mosaic.version = 11 : i64} {
  func.func @_cascade_gcn_kernel(%arg0: i32, %arg1: memref<1x16x8xf32, #tpu.memory_space<vmem>>, %arg2: memref<3x8x8xf32, #tpu.memory_space<vmem>>, %arg3: memref<1x16x8xf32, #tpu.memory_space<vmem>>) attributes {dimension_semantics = [#tpu.dimension_semantics<parallel>], iteration_bounds = array<i64: 2>, scalar_prefetch = 0 : i64, scratch_operands = 0 : i64, tpu.core_type = #tpu.core_type<tc>, window_params = [{transform_indices = @transform_0, window_bounds = array<i64: 1, 16, 8>}, {pipeline_mode = #tpu.pipeline_mode<synchronous>, transform_indices = @transform_1, window_bounds = array<i64: 3, 8, 8>}, {transform_indices = @transform_2, window_bounds = array<i64: 1, 16, 8>}]} {
    %c0 = arith.constant 0 : index
    %c0_0 = arith.constant 0 : index
    %c0_1 = arith.constant 0 : index
    %0 = vector.load %arg1[%c0, %c0_0, %c0_1] : memref<1x16x8xf32, #tpu.memory_space<vmem>>, vector<1x16x8xf32>
    %1 = vector.shape_cast %0 : vector<1x16x8xf32> to vector<16x8xf32>
    %c0_i32 = arith.constant 0 : i32
    %2 = arith.index_cast %c0_i32 : i32 to index
    %c0_2 = arith.constant 0 : index
    %c0_3 = arith.constant 0 : index
    %3 = vector.load %arg2[%2, %c0_2, %c0_3] : memref<3x8x8xf32, #tpu.memory_space<vmem>>, vector<1x8x8xf32>
    %4 = vector.shape_cast %3 : vector<1x8x8xf32> to vector<8x8xf32>
    %cst = arith.constant dense<0.000000e+00> : vector<16x16xf32>
    %5 = tpu.matmul %1, %1, %cst {dimension_numbers = #tpu.dot_dimension_numbers<[1], [1], [0], [0], [0, 0, 1, 0], [], []>} : vector<16x8xf32>, vector<16x8xf32>, vector<16x16xf32> -> vector<16x16xf32>
    %cst_4 = arith.constant dense<0xFF800000> : vector<16xf32>
    %6 = vector.multi_reduction <maximumf>, %5, %cst_4 [1] : vector<16x16xf32> to vector<16xf32>
    %7 = vector.shape_cast %6 : vector<16xf32> to vector<16x1xf32>
    %8 = vector.broadcast %7 : vector<16x1xf32> to vector<16x16xf32>
    %9 = arith.subf %5, %8 : vector<16x16xf32>
    %10 = math.exp %9 : vector<16x16xf32>
    %cst_5 = arith.constant dense<0.000000e+00> : vector<16xf32>
    %11 = vector.multi_reduction <add>, %10, %cst_5 [1] : vector<16x16xf32> to vector<16xf32>
    %12 = vector.shape_cast %11 : vector<16xf32> to vector<16x1xf32>
    %13 = tpu.reciprocal %12 {approx = true} : vector<16x1xf32> -> vector<16x1xf32>
    %14 = arith.mulf %12, %13 : vector<16x1xf32>
    %cst_6 = arith.constant 2.000000e+00 : f32
    %15 = vector.broadcast %cst_6 : f32 to vector<16x1xf32>
    %16 = arith.subf %15, %14 : vector<16x1xf32>
    %17 = arith.mulf %13, %16 : vector<16x1xf32>
    %18 = vector.broadcast %17 : vector<16x1xf32> to vector<16x16xf32>
    %19 = arith.mulf %10, %18 : vector<16x16xf32>
    %cst_7 = arith.constant dense<0.000000e+00> : vector<16x8xf32>
    %20 = tpu.matmul %1, %4, %cst_7 {dimension_numbers = #tpu.dot_dimension_numbers<[1], [0], [0], [1], [0, 0, 1, 1], [], []>} : vector<16x8xf32>, vector<8x8xf32>, vector<16x8xf32> -> vector<16x8xf32>
    %cst_8 = arith.constant dense<0.000000e+00> : vector<16x8xf32>
    %21 = tpu.matmul %19, %20, %cst_8 {dimension_numbers = #tpu.dot_dimension_numbers<[1], [0], [0], [1], [0, 0, 1, 1], [], []>} : vector<16x16xf32>, vector<16x8xf32>, vector<16x8xf32> -> vector<16x8xf32>
    %c1_i32 = arith.constant 1 : i32
    %22 = arith.index_cast %c1_i32 : i32 to index
    %c0_9 = arith.constant 0 : index
    %c0_10 = arith.constant 0 : index
    %23 = vector.load %arg2[%22, %c0_9, %c0_10] : memref<3x8x8xf32, #tpu.memory_space<vmem>>, vector<1x8x8xf32>
    %24 = vector.shape_cast %23 : vector<1x8x8xf32> to vector<8x8xf32>
    %cst_11 = arith.constant dense<0.000000e+00> : vector<16x16xf32>
    %25 = tpu.matmul %21, %21, %cst_11 {dimension_numbers = #tpu.dot_dimension_numbers<[1], [1], [0], [0], [0, 0, 1, 0], [], []>} : vector<16x8xf32>, vector<16x8xf32>, vector<16x16xf32> -> vector<16x16xf32>
    %cst_12 = arith.constant dense<0xFF800000> : vector<16xf32>
    %26 = vector.multi_reduction <maximumf>, %25, %cst_12 [1] : vector<16x16xf32> to vector<16xf32>
    %27 = vector.shape_cast %26 : vector<16xf32> to vector<16x1xf32>
    %28 = vector.broadcast %27 : vector<16x1xf32> to vector<16x16xf32>
    %29 = arith.subf %25, %28 : vector<16x16xf32>
    %30 = math.exp %29 : vector<16x16xf32>
    %cst_13 = arith.constant dense<0.000000e+00> : vector<16xf32>
    %31 = vector.multi_reduction <add>, %30, %cst_13 [1] : vector<16x16xf32> to vector<16xf32>
    %32 = vector.shape_cast %31 : vector<16xf32> to vector<16x1xf32>
    %33 = tpu.reciprocal %32 {approx = true} : vector<16x1xf32> -> vector<16x1xf32>
    %34 = arith.mulf %32, %33 : vector<16x1xf32>
    %cst_14 = arith.constant 2.000000e+00 : f32
    %35 = vector.broadcast %cst_14 : f32 to vector<16x1xf32>
    %36 = arith.subf %35, %34 : vector<16x1xf32>
    %37 = arith.mulf %33, %36 : vector<16x1xf32>
    %38 = vector.broadcast %37 : vector<16x1xf32> to vector<16x16xf32>
    %39 = arith.mulf %30, %38 : vector<16x16xf32>
    %cst_15 = arith.constant dense<0.000000e+00> : vector<16x8xf32>
    %40 = tpu.matmul %21, %24, %cst_15 {dimension_numbers = #tpu.dot_dimension_numbers<[1], [0], [0], [1], [0, 0, 1, 1], [], []>} : vector<16x8xf32>, vector<8x8xf32>, vector<16x8xf32> -> vector<16x8xf32>
    %cst_16 = arith.constant dense<0.000000e+00> : vector<16x8xf32>
    %41 = tpu.matmul %39, %40, %cst_16 {dimension_numbers = #tpu.dot_dimension_numbers<[1], [0], [0], [1], [0, 0, 1, 1], [], []>} : vector<16x16xf32>, vector<16x8xf32>, vector<16x8xf32> -> vector<16x8xf32>
    %c2_i32 = arith.constant 2 : i32
    %42 = arith.index_cast %c2_i32 : i32 to index
    %c0_17 = arith.constant 0 : index
    %c0_18 = arith.constant 0 : index
    %43 = vector.load %arg2[%42, %c0_17, %c0_18] : memref<3x8x8xf32, #tpu.memory_space<vmem>>, vector<1x8x8xf32>
    %44 = vector.shape_cast %43 : vector<1x8x8xf32> to vector<8x8xf32>
    %cst_19 = arith.constant dense<0.000000e+00> : vector<16x16xf32>
    %45 = tpu.matmul %41, %41, %cst_19 {dimension_numbers = #tpu.dot_dimension_numbers<[1], [1], [0], [0], [0, 0, 1, 0], [], []>} : vector<16x8xf32>, vector<16x8xf32>, vector<16x16xf32> -> vector<16x16xf32>
    %cst_20 = arith.constant dense<0xFF800000> : vector<16xf32>
    %46 = vector.multi_reduction <maximumf>, %45, %cst_20 [1] : vector<16x16xf32> to vector<16xf32>
    %47 = vector.shape_cast %46 : vector<16xf32> to vector<16x1xf32>
    %48 = vector.broadcast %47 : vector<16x1xf32> to vector<16x16xf32>
    %49 = arith.subf %45, %48 : vector<16x16xf32>
    %50 = math.exp %49 : vector<16x16xf32>
    %cst_21 = arith.constant dense<0.000000e+00> : vector<16xf32>
    %51 = vector.multi_reduction <add>, %50, %cst_21 [1] : vector<16x16xf32> to vector<16xf32>
    %52 = vector.shape_cast %51 : vector<16xf32> to vector<16x1xf32>
    %53 = tpu.reciprocal %52 {approx = true} : vector<16x1xf32> -> vector<16x1xf32>
    %54 = arith.mulf %52, %53 : vector<16x1xf32>
    %cst_22 = arith.constant 2.000000e+00 : f32
    %55 = vector.broadcast %cst_22 : f32 to vector<16x1xf32>
    %56 = arith.subf %55, %54 : vector<16x1xf32>
    %57 = arith.mulf %53, %56 : vector<16x1xf32>
    %58 = vector.broadcast %57 : vector<16x1xf32> to vector<16x16xf32>
    %59 = arith.mulf %50, %58 : vector<16x16xf32>
    %cst_23 = arith.constant dense<0.000000e+00> : vector<16x8xf32>
    %60 = tpu.matmul %41, %44, %cst_23 {dimension_numbers = #tpu.dot_dimension_numbers<[1], [0], [0], [1], [0, 0, 1, 1], [], []>} : vector<16x8xf32>, vector<8x8xf32>, vector<16x8xf32> -> vector<16x8xf32>
    %cst_24 = arith.constant dense<0.000000e+00> : vector<16x8xf32>
    %61 = tpu.matmul %59, %60, %cst_24 {dimension_numbers = #tpu.dot_dimension_numbers<[1], [0], [0], [1], [0, 0, 1, 1], [], []>} : vector<16x16xf32>, vector<16x8xf32>, vector<16x8xf32> -> vector<16x8xf32>
    %c3_i32 = arith.constant 3 : i32
    %cst_25 = arith.constant 0.000000e+00 : f32
    %62 = vector.broadcast %cst_25 : f32 to vector<16x8xf32>
    %63 = arith.maximumf %61, %62 : vector<16x8xf32>
    %c0_26 = arith.constant 0 : index
    %c0_27 = arith.constant 0 : index
    %c0_28 = arith.constant 0 : index
    %64 = vector.load %arg3[%c0_26, %c0_27, %c0_28] : memref<1x16x8xf32, #tpu.memory_space<vmem>>, vector<1x16x8xf32>
    %65 = vector.shape_cast %64 : vector<1x16x8xf32> to vector<16x8xf32>
    %66 = vector.shape_cast %63 : vector<16x8xf32> to vector<1x16x8xf32>
    tpu.vector_store %arg3[%c0_26, %c0_27, %c0_28], %66 {strides = array<i32>} : memref<1x16x8xf32, #tpu.memory_space<vmem>>, vector<1x16x8xf32>,
    return
  }
  func.func @transform_0(%arg0: i32) -> (i32, i32, i32) {
    %c0_i32 = arith.constant 0 : i32
    %c0_i32_0 = arith.constant 0 : i32
    %c0_i32_1 = arith.constant 0 : i32
    return %arg0, %c0_i32, %c0_i32_0 : i32, i32, i32
  }
  func.func @transform_1(%arg0: i32) -> (i32, i32, i32) {
    %c0_i32 = arith.constant 0 : i32
    %c0_i32_0 = arith.constant 0 : i32
    %c0_i32_1 = arith.constant 0 : i32
    %c0_i32_2 = arith.constant 0 : i32
    return %c0_i32, %c0_i32_0, %c0_i32_1 : i32, i32, i32
  }
  func.func @transform_2(%arg0: i32) -> (i32, i32, i32) {
    %c0_i32 = arith.constant 0 : i32
    %c0_i32_0 = arith.constant 0 : i32
    %c0_i32_1 = arith.constant 0 : i32
    return %arg0, %c0_i32, %c0_i32_0 : i32, i32, i32
  }
}

</mosaic_0001>

<bundles_post_ra>
// kernel: tpu_custom_call.1
= control target key start
LH: loop header
LB: loop body
LE: loop exit
PB: predicated region body
PF: predicated region fallthrough
CT: control target
= control target key end

     0   :  { %s1221_s9 = smov 0   ;;  %s1304_s0 = inlined_call_operand.vmem [shape: f32[2,16,8], index: 0, kind: input, shape index: {}]   ;;  %s1305_s1 = inlined_call_operand.vmem [shape: f32[3,8,8], index: 1, kind: input, shape index: {}]   ;;  %s1306_s2 = inlined_call_operand.vmem [shape: f32[2,16,8], index: 2, kind: output, shape index: {}]  }
   0x1 LB: > { %s1007_s10 = sadd.s32 4294967295, %s1204_s9   ;;  %p1011_p0 = scmp.ge.s32.totalorder %s1204_s9, 1  ;;  %s1204_s9 = sphi %s1221_s9, %s12_s9  }
   0x2   : > { %p112_p1 = scmp.lt.s32.totalorder %s1204_s9, 3 }
   0x4   : > { %p113_p2 = pnand %p1011_p0, %p112_p1 }
   0x5   : > { %p134_p3 = scmp.lt.s32.totalorder (!%p113_p2), %s1007_s10, 1  ;;  %vm147_vm0 = vcmask (!%p113_p2), 64512   ;;  %v146_v4 = vld [vmem:[%s1305_s1] sm:$0xff] (!%p113_p2)  ;;  %vm229_vm2 = vcmask (!%p113_p2), 130048   ;;  %v1024_v34 = vld [vmem:[%s1305_s1 + $0x8] sm:$0xff] (!%p113_p2) }
   0x6   : > { %116 = sbr.rel (%p113_p2) target bundleno = 2294 (0x8f6), region = 28  ;;  %vm1239_vm1 = vmpackc.low (!%p113_p2), %vm147_vm0, %vm147_vm0  ;;  %1086 = vmatprep.subr.mxu1 (!%p113_p2), %v146_v4 }
   0x7   : > { %1087 = vmatpush3.msra.mxu1 (!%p113_p2), %v146_v4  ;;  %v1033_v4 = vld [vmem:[%s1305_s1 + $0x10] sm:$0xff] (!%p113_p2) }
   0xd   : > { %s1310_s10 = smov (!%p134_p3, %s1007_s10), 1 }
   0xe   : > { %s1044_s11 = sshll.u32 %s1310_s10, 4 }
   0xf   : > { %s138_s14 = scalar_lea.vmem %s1304_s0, %s1044_s11  ;;  %s143_s23 = scalar_lea.vmem %s1306_s2, %s1044_s11 }
  0x10   : > { %v144_v0 = vld [vmem:[%s138_s14] sm:$0xff]  ;;  %v145_v1 = vld [vmem:[%s138_s14 + $0x8] sm:$0xff] }
  0x11   : > { %v1136_v3 = vpack.c.bf16 %v145_v1, %v144_v0  ;;  %1083 = vmatprep.mubr.msk.f32.mxu0 %vm147_vm0, %v144_v0  ;;  %1088 = vmatprep.mubr.msk.f32.mxu1 %vm147_vm0, %v144_v0 }
  0x12   : > { %1089 = vmatmul.mubr.msk.f32.vlgmr.msra.gmra.mrb[0].mxu1 %vm147_vm0, %v145_v1 }
  0x13   : > { %1138 = vmatprep.subr.msk.bf16.mxu0 %vm1239_vm1, %v1136_v3 }
  0x14   : > { %1141 = vmatpush3.bf16.xpose.msk.msra.mxu0 %vm1239_vm1, %v1136_v3 }
  0x15   : > { %1105 = vmatprep.subr.mxu0 %v1024_v34 }
  0x1b   : > { %1084 = vmatmul.mubr.msk.f32.vlgmr.msra.gmra.mrb[0].mxu0 %vm147_vm0, %v145_v1 }
  0x1c   : > { %1106 = vmatpush3.msra.mxu0 %v1024_v34 }
  0xe5   : > { %v1090_v19 = vpop.f32.mrb[0].mxu1 }
  0xe6   : > { %v324_v20 = vpop.f32.mrb[1].mxu1 }
  0xe7   : > { %v1142_v21 = vpack.c.bf16 %v1090_v19, %v324_v20 }
  0xe9   : > { %1143 = vmatprep.subr.bf16.mxu1 %v1142_v21 }
  0xea   : > { %1145 = vmatpush3.bf16.msra.mxu1 %v1142_v21 }
  0xee   : > { %v1085_v5 = vpop.f32.mrb[0].mxu0 }
  0xef   : > { %v220_v6 = vpop.f32.mrb[1].mxu0  ;;  %v233_v8 = vsel %vm229_vm2, %v1085_v5, -inf }
  0xf0   : > { %v230_v7 = vsel %vm229_vm2, %v220_v6, -inf }
  0xf1   : > { %231 = vmax.xlane.f32.xlu0 %v230_v7 }
  0xf5   : > { %234 = vmax.xlane.f32.xlu0 %v233_v8 }
 0x17e   : > { %v232_v9 = vpop.xlane.xlu0 %231 }
 0x17f   : > { %v236_v10 = vsub.f32 %v220_v6, %v232_v9 }
 0x181   : > { %v238_v11 = vmul.f32 1.442695, %v236_v10 }
 0x182   : > { %v235_v12 = vpop.xlane.xlu0 %234 }
 0x183   : > { %1174 = vpow2.f32 %v238_v11  ;;  %v237_v13 = vsub.f32 %v1085_v5, %v235_v12 }
 0x185   : > { %v240_v14 = vmul.f32 1.442695, %v237_v13 }
 0x187   : > { %1176 = vpow2.f32 %v240_v14 }
 0x18d   : > { %v1175_v15 = vpop.eup %1174 }
 0x18e   : > { %v242_v16 = vsel %vm229_vm2, %v1175_v15, 0.0 }
 0x18f   : > { %243 = vadd.xlane.f32.xlu1 %v242_v16 }
 0x191   : > { %v1177_v17 = vpop.eup %1176 }
 0x192   : > { %v245_v18 = vsel %vm229_vm2, %v1177_v17, 0.0 }
 0x193   : > { %246 = vadd.xlane.f32.xlu1 %v245_v18 }
 0x21c   : > { %v244_v22 = vpop.xlane.xlu1 %243 }
 0x21d   : > { %1178 = vrcp.f32 %v244_v22 }
 0x220   : > { %v247_v23 = vpop.xlane.xlu1 %246 }
 0x221   : > { %1180 = vrcp.f32 %v247_v23 }
 0x227   : > { %v1179_v24 = vpop.eup %1178 }
 0x228   : > { %v250_v25 = vmul.f32 %v1179_v24, %v244_v22 }
 0x22a   : > { %v252_v26 = vsub.f32 2.0, %v250_v25 }
 0x22b   : > { %v1181_v27 = vpop.eup %1180 }
 0x22c   : > { %v254_v28 = vmul.f32 %v1179_v24, %v252_v26  ;;  %v251_v29 = vmul.f32 %v1181_v27, %v247_v23 }
 0x22e   : > { %v256_v30 = vmul.f32 %v1175_v15, %v254_v28  ;;  %v253_v31 = vsub.f32 2.0, %v251_v29 }
 0x230   : > { %v255_v32 = vmul.f32 %v1181_v27, %v253_v31  ;;  %1095 = vmatprep.mubr.msk.f32.mxu1 %vm229_vm2, %v256_v30 }
 0x232   : > { %v257_v33 = vmul.f32 %v1177_v17, %v255_v32 }
 0x234   : > { %1096 = vmatmul.mubr.msk.f32.vlgmr.msra.gmra.mrb[2].mxu1 %vm229_vm2, %v257_v33 }
 0x307   : > { %v1097_v35 = vpop.f32.mrb[2].mxu1 }
 0x308   : > { %v405_v36 = vpop.f32.mrb[3].mxu1 }
 0x309   : > { %v1146_v37 = vpack.c.bf16 %v1097_v35, %v405_v36  ;;  %1102 = vmatprep.mubr.msk.f32.mxu1 %vm147_vm0, %v405_v36  ;;  %1107 = vmatprep.mubr.msk.f32.mxu0 %vm147_vm0, %v405_v36 }
 0x30a   : > { %1108 = vmatmul.mubr.msk.f32.vlgmr.msra.gmra.mrb[2].mxu0 %vm147_vm0, %v1097_v35 }
 0x30b   : > { %1148 = vmatprep.subr.msk.bf16.mxu1 %vm1239_vm1, %v1146_v37 }
 0x30c   : > { %1151 = vmatpush3.bf16.xpose.msk.msra.mxu1 %vm1239_vm1, %v1146_v37 }
 0x313   : > { %1103 = vmatmul.mubr.msk.f32.vlgmr.msra.gmra.mrb[4].mxu1 %vm147_vm0, %v1097_v35 }
 0x3dd   : > { %v1109_v38 = vpop.f32.mrb[2].mxu0 }
 0x3de   : > { %v591_v39 = vpop.f32.mrb[3].mxu0 }
 0x3df   : > { %v1152_v40 = vpack.c.bf16 %v1109_v38, %v591_v39 }
 0x3e1   : > { %1153 = vmatprep.subr.bf16.mxu0 %v1152_v40 }
 0x3e2   : > { %1155 = vmatpush3.bf16.msra.mxu0 %v1152_v40 }
 0x3e3   : > { %1124 = vmatprep.subr.mxu0 %v1033_v4 }
 0x3e6   : > { %v1104_v41 = vpop.f32.mrb[4].mxu1 }
 0x3e7   : > { %v488_v42 = vpop.f32.mrb[5].mxu1  ;;  %v500_v43 = vsel %vm229_vm2, %v1104_v41, -inf }
 0x3e8   : > { %501 = vmax.xlane.f32.xlu1 %v500_v43  ;;  %v497_v44 = vsel %vm229_vm2, %v488_v42, -inf }
 0x3e9   : > { %498 = vmax.xlane.f32.xlu0 %v497_v44 }
 0x475   : > { %v502_v45 = vpop.xlane.xlu1 %501 }
 0x476   : > { %v504_v46 = vsub.f32 %v1104_v41, %v502_v45  ;;  %v499_v47 = vpop.xlane.xlu0 %498 }
 0x477   : > { %v503_v48 = vsub.f32 %v488_v42, %v499_v47 }
 0x478   : > { %v507_v49 = vmul.f32 1.442695, %v504_v46 }
 0x479   : > { %v505_v50 = vmul.f32 1.442695, %v503_v48 }
 0x47a   : > { %1182 = vpow2.f32 %v507_v49 }
 0x47b   : > { %1184 = vpow2.f32 %v505_v50 }
 0x484   : > { %v1183_v51 = vpop.eup %1182 }
 0x485   : > { %v1185_v52 = vpop.eup %1184  ;;  %v512_v53 = vsel %vm229_vm2, %v1183_v51, 0.0 }
 0x486   : > { %513 = vadd.xlane.f32.xlu1 %v512_v53  ;;  %v509_v54 = vsel %vm229_vm2, %v1185_v52, 0.0 }
 0x487   : > { %510 = vadd.xlane.f32.xlu0 %v509_v54 }
 0x513   : > { %v514_v55 = vpop.xlane.xlu1 %513 }
 0x514   : > { %1186 = vrcp.f32 %v514_v55  ;;  %v511_v56 = vpop.xlane.xlu0 %510 }
 0x515   : > { %1188 = vrcp.f32 %v511_v56 }
 0x51e   : > { %v1187_v57 = vpop.eup %1186 }
 0x51f   : > { %v1189_v58 = vpop.eup %1188  ;;  %v518_v59 = vmul.f32 %v1187_v57, %v514_v55 }
 0x520   : > { %v517_v60 = vmul.f32 %v1189_v58, %v511_v56 }
 0x521   : > { %v520_v61 = vsub.f32 2.0, %v518_v59 }
 0x522   : > { %v519_v62 = vsub.f32 2.0, %v517_v60 }
 0x523   : > { %v522_v63 = vmul.f32 %v1187_v57, %v520_v61 }
 0x524   : > { %v521_v0 = vmul.f32 %v1189_v58, %v519_v62 }
 0x525   : > { %v524_v3 = vmul.f32 %v1183_v51, %v522_v63 }
 0x526   : > { %v523_v1 = vmul.f32 %v1185_v52, %v521_v0 }
 0x528   : > { %1114 = vmatprep.mubr.msk.f32.mxu0 %vm229_vm2, %v523_v1 }
 0x529   : > { %1115 = vmatmul.mubr.msk.f32.vlgmr.msra.gmra.mrb[4].mxu0 %vm229_vm2, %v524_v3 }
 0x52a   : > { %1125 = vmatpush3.msra.mxu0 %v1033_v4 }
 0x5fc   : > { %v1116_v5 = vpop.f32.mrb[4].mxu0 }
 0x5fd   : > { %v672_v6 = vpop.f32.mrb[5].mxu0 }
 0x5fe   : > { %v1156_v7 = vpack.c.bf16 %v1116_v5, %v672_v6  ;;  %1121 = vmatprep.mubr.msk.f32.mxu1 %vm147_vm0, %v672_v6  ;;  %1126 = vmatprep.mubr.msk.f32.mxu0 %vm147_vm0, %v672_v6 }
 0x5ff   : > { %1127 = vmatmul.mubr.msk.f32.vlgmr.msra.gmra.mrb[6].mxu0 %vm147_vm0, %v1116_v5 }
 0x600   : > { %1158 = vmatprep.subr.msk.bf16.mxu1 %vm1239_vm1, %v1156_v7 }
 0x601   : > { %1161 = vmatpush3.bf16.xpose.msk.msra.mxu1 %vm1239_vm1, %v1156_v7 }
 0x608   : > { %1122 = vmatmul.mubr.msk.f32.vlgmr.msra.gmra.mrb[6].mxu1 %vm147_vm0, %v1116_v5 }
 0x6d2   : > { %v1128_v8 = vpop.f32.mrb[6].mxu0 }
 0x6d3   : > { %v858_v9 = vpop.f32.mrb[7].mxu0 }
 0x6d4   : > { %v1162_v10 = vpack.c.bf16 %v1128_v8, %v858_v9 }
 0x6d6   : > { %1163 = vmatprep.subr.bf16.mxu0 %v1162_v10 }
 0x6d7   : > { %1165 = vmatpush3.bf16.msra.mxu0 %v1162_v10 }
 0x6db   : > { %v1123_v11 = vpop.f32.mrb[6].mxu1 }
 0x6dc   : > { %v755_v12 = vpop.f32.mrb[7].mxu1  ;;  %v767_v13 = vsel %vm229_vm2, %v1123_v11, -inf }
 0x6dd   : > { %768 = vmax.xlane.f32.xlu1 %v767_v13  ;;  %v764_v14 = vsel %vm229_vm2, %v755_v12, -inf }
 0x6de   : > { %765 = vmax.xlane.f32.xlu0 %v764_v14 }
 0x76a   : > { %v769_v15 = vpop.xlane.xlu1 %768 }
 0x76b   : > { %v771_v16 = vsub.f32 %v1123_v11, %v769_v15  ;;  %v766_v17 = vpop.xlane.xlu0 %765 }
 0x76c   : > { %v770_v2 = vsub.f32 %v755_v12, %v766_v17 }
 0x76d   : > { %v774_v18 = vmul.f32 1.442695, %v771_v16 }
 0x76e   : > { %v772_v19 = vmul.f32 1.442695, %v770_v2 }
 0x76f   : > { %1190 = vpow2.f32 %v774_v18 }
 0x770   : > { %1192 = vpow2.f32 %v772_v19 }
 0x779   : > { %v1191_v20 = vpop.eup %1190 }
 0x77a   : > { %v1193_v21 = vpop.eup %1192  ;;  %v779_v22 = vsel %vm229_vm2, %v1191_v20, 0.0 }
 0x77b   : > { %780 = vadd.xlane.f32.xlu1 %v779_v22  ;;  %v776_v23 = vsel %vm229_vm2, %v1193_v21, 0.0 }
 0x77c   : > { %777 = vadd.xlane.f32.xlu0 %v776_v23 }
 0x808   : > { %v781_v24 = vpop.xlane.xlu1 %780 }
 0x809   : > { %1194 = vrcp.f32 %v781_v24  ;;  %v778_v25 = vpop.xlane.xlu0 %777 }
 0x80a   : > { %1196 = vrcp.f32 %v778_v25 }
 0x813   : > { %v1195_v26 = vpop.eup %1194 }
 0x814   : > { %v1197_v27 = vpop.eup %1196  ;;  %v785_v28 = vmul.f32 %v1195_v26, %v781_v24 }
 0x815   : > { %v784_v29 = vmul.f32 %v1197_v27, %v778_v25 }
 0x816   : > { %v787_v30 = vsub.f32 2.0, %v785_v28 }
 0x817   : > { %v786_v31 = vsub.f32 2.0, %v784_v29 }
 0x818   : > { %v789_v32 = vmul.f32 %v1195_v26, %v787_v30 }
 0x819   : > { %v788_v33 = vmul.f32 %v1197_v27, %v786_v31 }
 0x81a   : > { %v791_v35 = vmul.f32 %v1191_v20, %v789_v32 }
 0x81b   : > { %v790_v34 = vmul.f32 %v1193_v21, %v788_v33 }
 0x81d   : > { %1133 = vmatprep.mubr.msk.f32.mxu0 %vm229_vm2, %v790_v34 }
 0x81e   : > { %1134 = vmatmul.mubr.msk.f32.vlgmr.msra.gmra.mrb[8].mxu0 %vm229_vm2, %v791_v35 }
 0x8f1   : > { %v1135_v36 = vpop.f32.mrb[8].mxu0 }
 0x8f2   : > { %v949_v37 = vmax.f32 %v1135_v36, 0.0  ;;  %v939_v38 = vpop.f32.mrb[9].mxu0 }
 0x8f3   : > { %v948_v39 = vmax.f32 %v939_v38, 0.0 }
 0x8f4   : > { %951 = vst.msk [vmem:[%s143_s23 + $0x8] sm:$0xff] %vm147_vm0, %v949_v37 }
 0x8f5   : > { %950 = vst.msk [vmem:[%s143_s23] sm:$0xff] %vm147_vm0, %v948_v39 }
 0x8f6 PF: > { %s12_s9 = sadd.s32 1, %s1204_s9  }
 0x8f7   : > { %p9_p4 = scmp.ge.s32.totalorder %s12_s9, 4  }
 0x8f9   :  { %11 = sbr.rel (!%p9_p4) target bundleno = 1 (0x1), region = 60 }

</bundles_post_ra>
